<compile_context>
chip_gen: v7x
topology: tpu7x:2x2x1
jax: 0.10.0
libtpu: 0.0.40
codegen_flags: <defaults>
</compile_context>

<pallas_src>
import functools

import jax
import jax.numpy as jnp
from jax import lax
from jax.experimental import pallas as pl
from jax.experimental.pallas import tpu as pltpu


def _round_up(x, m):
    return (x + m - 1) // m * m


def _round_down(x, m):
    return max(m, x // m * m)


def _focal_pow(pt, gamma):
    """(1 - pt)**gamma with a clamped base; multiply chain for integer gamma."""
    base = jnp.maximum(1.0 - pt, 0.0)          # pt can round slightly above 1
    g = float(gamma)
    if g == 2.0:
        return base * base                     # one VPU mul
    if g.is_integer() and g >= 0.0:
        return lax.integer_pow(base, int(g))   # VPU multiply chain
    return base ** g                           # general path (EUP exp/log)


def _focal_lane_major_kernel(logits_t_ref, targets_ref, weights_ref, out_ref,
                             *, gamma, n_true, tile_n):
    """Small-C path: logits transposed to (C, TILE_N), samples on the lane axis."""
    i = pl.program_id(0)
    x = logits_t_ref[...].astype(jnp.float32)       # (C, TN) — cast in-kernel
    tgt = targets_ref[...]                          # (1, TN) int32
    w = weights_ref[...].astype(jnp.float32)        # (C, 1)
    c, tn = x.shape

    # Numerically-stable softmax pieces over the short class/sublane axis.
    m = jnp.max(x, axis=0, keepdims=True)                                # (1, TN)
    e = jnp.exp(x - m)                                                   # (C, TN)
    sum_e = jnp.sum(e, axis=0, keepdims=True)                            # (1, TN)

    # where-select (no f32 one-hot materialization / mul chain).
    class_ids = lax.broadcasted_iota(jnp.int32, (c, tn), 0)
    onehot = class_ids == tgt                                            # (C, TN) bool
    x_true = jnp.sum(jnp.where(onehot, x, 0.0), axis=0, keepdims=True)   # (1, TN)
    e_true = jnp.sum(jnp.where(onehot, e, 0.0), axis=0, keepdims=True)   # (1, TN)
    w_true = jnp.sum(jnp.where(onehot, w, 0.0), axis=0, keepdims=True)   # (1, TN)

    ce = (jnp.log(sum_e) + m) - x_true              # per-sample CE
    pt = e_true / sum_e                             # exp(-ce), reusing e (no 2nd exp)
    f_loss = w_true * _focal_pow(pt, gamma) * ce    # (1, TN)

    # Mask ragged-tail columns (partial last block contents are undefined);
    # this must stay after all elementwise ops and right before the sum.
    col_ids = i * tile_n + lax.broadcasted_iota(jnp.int32, (1, tn), 1)
    f_loss = jnp.where(col_ids < n_true, f_loss, 0.0)

    out_ref[...] = jnp.broadcast_to(jnp.sum(f_loss, keepdims=True), (1, 128))


def _focal_row_major_kernel(logits_ref, targets_ref, weights_ref, out_ref,
                            *, gamma, n_true, tile_n):
    """Large-C path: natural (TILE_N, C) layout, classes on the lane axis."""
    i = pl.program_id(0)
    x = logits_ref[...].astype(jnp.float32)         # (TN, C)
    tgt = targets_ref[...]                          # (TN, 1) int32
    w = weights_ref[...].astype(jnp.float32)        # (1, C)
    tn, c = x.shape

    m = jnp.max(x, axis=-1, keepdims=True)                               # (TN, 1)
    e = jnp.exp(x - m)                                                   # (TN, C)
    sum_e = jnp.sum(e, axis=-1, keepdims=True)                           # (TN, 1)

    class_ids = lax.broadcasted_iota(jnp.int32, (tn, c), 1)
    onehot = class_ids == tgt                                            # (TN, C) bool
    x_true = jnp.sum(jnp.where(onehot, x, 0.0), axis=-1, keepdims=True)  # (TN, 1)
    e_true = jnp.sum(jnp.where(onehot, e, 0.0), axis=-1, keepdims=True)  # (TN, 1)
    w_true = jnp.sum(jnp.where(onehot, w, 0.0), axis=-1, keepdims=True)  # (TN, 1)

    ce = (jnp.log(sum_e) + m) - x_true
    pt = e_true / sum_e
    f_loss = w_true * _focal_pow(pt, gamma) * ce                         # (TN, 1)

    # Mask ragged-tail rows of the partial last block.
    row_ids = i * tile_n + lax.broadcasted_iota(jnp.int32, (tn, 1), 0)
    f_loss = jnp.where(row_ids < n_true, f_loss, 0.0)

    out_ref[...] = jnp.broadcast_to(jnp.sum(f_loss, keepdims=True), (1, 128))


def _vmem_capacity_bytes():
    try:
        return int(pltpu.get_tpu_info().vmem_capacity_bytes)
    except Exception:
        return 64 * 1024 * 1024   # conservative (v7x-sized) fallback


def weighted_focal_loss(logits, targets, weights, gamma=2.0):
    """logits: (N, C), targets: (N,) int, weights: (C,) -> scalar mean focal loss."""
    logits = jnp.squeeze(logits)                    # mirror the torch module
    if logits.ndim == 1:
        logits = logits[None, :]
    targets = jnp.reshape(jnp.squeeze(targets), (-1,)).astype(jnp.int32)
    weights = jnp.asarray(weights)

    n, c = logits.shape
    itemsize = jnp.dtype(logits.dtype).itemsize

    vmem_cap = _vmem_capacity_bytes()
    # ~64 MiB scoped VMEM on v5e/v6e (128 MiB physical), ~32 MiB on v7x (64 MiB).
    vmem_limit = int(min(64 * 2**20, max(32 * 2**20, vmem_cap // 2)))

    lane_major = c < 128

    if lane_major:
        # (C, N) layout: one copy pass at the INPUT dtype (no cast / no pad),
        # then the kernel streams lane-dense (C, tile_n) blocks.
        x_arg = logits.T                             # (C, N)
        t_arg = targets.reshape(1, n)                # (1, N) — zero-copy reshape
        w_arg = weights.reshape(c, 1)                # (C, 1)

        f32_row_bytes = _round_up(c, 8) * 4          # f32 footprint of one column slab
        if n < 128:
            tile_n = n                               # block == full array (allowed)
        else:
            tile_n = _round_down(min((1 << 20) // f32_row_bytes, 32768, n), 128)
            # Keep >=4 grid steps for v7x's two TensorCores while blocks stay big.
            quarter = _round_up(pl.cdiv(n, 4), 128)
            if quarter * c * 4 >= (512 << 10):
                tile_n = min(tile_n, quarter)

        kernel = functools.partial(_focal_lane_major_kernel,
                                   gamma=float(gamma), n_true=n, tile_n=tile_n)
        in_specs = [
            pl.BlockSpec((c, tile_n), lambda i: (0, i)),
            pl.BlockSpec((1, tile_n), lambda i: (0, i)),
            pl.BlockSpec((c, 1), lambda i: (0, 0)),
        ]
    else:
        # Natural (N, C) layout streamed straight from HBM (no wrapper passes).
        x_arg = logits                               # (N, C) untouched
        t_arg = targets.reshape(n, 1)                # (N, 1)
        w_arg = weights.reshape(1, c)                # (1, C)

        # Generation-aware per-block f32 budget: ~6 MiB on 128 MiB-VMEM chips,
        # ~3 MiB on v7x's 64 MiB; rows capped at 4096.
        row_budget = max(1 << 20, min(6 << 20, vmem_cap // 20))
        if n <= 8:
            tile_n = n
        else:
            tile_n = _round_down(min(row_budget // (c * 4), 4096, n), 8)
            quarter = _round_up(pl.cdiv(n, 4), 8)
            if quarter * c * 4 >= (512 << 10):
                tile_n = min(tile_n, quarter)

        kernel = functools.partial(_focal_row_major_kernel,
                                   gamma=float(gamma), n_true=n, tile_n=tile_n)
        in_specs = [
            pl.BlockSpec((tile_n, c), lambda i: (i, 0)),
            pl.BlockSpec((tile_n, 1), lambda i: (i, 0)),
            pl.BlockSpec((1, c), lambda i: (0, 0)),
        ]

    num_tiles = pl.cdiv(n, tile_n)

    cost = pl.CostEstimate(
        flops=12 * n * c,
        transcendentals=n * c + 3 * n,               # exp(x-m) + log/recip/pow per sample
        bytes_accessed=n * c * itemsize + 4 * n + 4 * c + 4 * num_tiles * 128,
    )

    partials = pl.pallas_call(
        kernel,
        out_shape=jax.ShapeDtypeStruct((1, num_tiles * 128), jnp.float32),
        grid=(num_tiles,),
        in_specs=in_specs,
        # Each grid step writes its own lane-dense (1, 128) partial-sum block.
        out_specs=pl.BlockSpec((1, 128), lambda i: (0, i)),
        compiler_params=pltpu.CompilerParams(
            dimension_semantics=("parallel",),
            vmem_limit_bytes=vmem_limit,
        ),
        cost_estimate=cost,
    )(x_arg, t_arg, w_arg)

    # Each block holds its partial sum broadcast across 128 lanes; take one lane
    # per tile, sum, and divide by the true (unpadded) sample count.
    per_tile = partials.reshape(num_tiles, 128)[:, 0]
    return jnp.sum(per_tile) / n


def _reference(logits, targets, weights, gamma=2.0):
    # Pure-JAX reference of the PyTorch forward for sanity checking.
    logits = logits.astype(jnp.float32)
    logp = jax.nn.log_softmax(logits, axis=-1)
    ce = -jnp.take_along_axis(logp, targets[:, None].astype(jnp.int32), axis=-1)[:, 0]
    pt = jnp.exp(-ce)
    return jnp.mean(jnp.asarray(weights)[targets] * (1.0 - pt) ** gamma * ce)


if __name__ == "__main__":
    key = jax.random.PRNGKey(0)
    k1, k2, k3, k4, k5, k6 = jax.random.split(key, 6)

    # 1) Small-class case matching the module's typical use (lane-major path).
    N, C = 8, 4
    logits = jax.random.normal(k1, (N, C), dtype=jnp.float32)
    targets = jax.random.randint(k2, (N,), 0, C, dtype=jnp.int32)
    class_weights = jnp.array([1.0, 2.0, 0.5, 1.5], dtype=jnp.float32)

    loss = jax.block_until_ready(
        weighted_focal_loss(logits, targets, class_weights, gamma=2.0))
    ref = _reference(logits, targets, class_weights, gamma=2.0)
    assert jnp.allclose(loss, ref, rtol=1e-5, atol=1e-6), (loss, ref)

    # 2) bf16 logits, ragged N (multi-tile lane-major path with a partial block,
    #    bf16 DMA'd directly — no wrapper f32 cast / pad).
    Nb, Cb = 1000, 4
    logits_b = jax.random.normal(k3, (Nb, Cb), dtype=jnp.float32).astype(jnp.bfloat16)
    targets_b = jax.random.randint(k4, (Nb,), 0, Cb, dtype=jnp.int32)
    loss_b = jax.block_until_ready(
        weighted_focal_loss(logits_b, targets_b, class_weights, gamma=2.0))
    ref_b = _reference(logits_b, targets_b, class_weights, gamma=2.0)
    assert jnp.allclose(loss_b, ref_b, rtol=1e-4, atol=1e-5), (loss_b, ref_b)

    # 3) Large-class case: row-major path, multi-tile grid + ragged-tail mask.
    N2, C2 = 2500, 256
    logits2 = jax.random.normal(k5, (N2, C2), dtype=jnp.float32)
    targets2 = jax.random.randint(k6, (N2,), 0, C2, dtype=jnp.int32)
    weights2 = jnp.linspace(0.5, 2.0, C2, dtype=jnp.float32)
    loss2 = jax.block_until_ready(
        weighted_focal_loss(logits2, targets2, weights2, gamma=2.0))
    ref2 = _reference(logits2, targets2, weights2, gamma=2.0)
    assert jnp.allclose(loss2, ref2, rtol=1e-5, atol=1e-5), (loss2, ref2)

    # 4) Non-integer gamma exercises the general (clamped pow) path.
    loss3 = jax.block_until_ready(
        weighted_focal_loss(logits, targets, class_weights, gamma=1.5))
    ref3 = _reference(logits, targets, class_weights, gamma=1.5)
    assert jnp.allclose(loss3, ref3, rtol=1e-5, atol=1e-6), (loss3, ref3)

    print("KERNEL_OK")
</pallas_src>

<mosaic_0001>
module attributes {stable_mosaic.version = 11 : i64} {
  func.func @_focal_lane_major_kernel(%arg0: i32, %arg1: memref<4x8xf32, #tpu.memory_space<vmem>>, %arg2: memref<1x8xi32, #tpu.memory_space<vmem>>, %arg3: memref<4x1xf32, #tpu.memory_space<vmem>>, %arg4: memref<1x128xf32, #tpu.memory_space<vmem>>) attributes {dimension_semantics = [#tpu.dimension_semantics<parallel>], iteration_bounds = array<i64: 1>, scalar_prefetch = 0 : i64, scratch_operands = 0 : i64, tpu.core_type = #tpu.core_type<tc>, window_params = [{transform_indices = @transform_0, window_bounds = array<i64: 4, 8>}, {transform_indices = @transform_1, window_bounds = array<i64: 1, 8>}, {pipeline_mode = #tpu.pipeline_mode<synchronous>, transform_indices = @transform_2, window_bounds = array<i64: 4, 1>}, {transform_indices = @transform_3, window_bounds = array<i64: 1, 128>}]} {
    %c0 = arith.constant 0 : index
    %c0_0 = arith.constant 0 : index
    %0 = vector.load %arg1[%c0, %c0_0] : memref<4x8xf32, #tpu.memory_space<vmem>>, vector<4x8xf32>
    %c0_1 = arith.constant 0 : index
    %c0_2 = arith.constant 0 : index
    %1 = vector.load %arg2[%c0_1, %c0_2] : memref<1x8xi32, #tpu.memory_space<vmem>>, vector<1x8xi32>
    %c0_3 = arith.constant 0 : index
    %c0_4 = arith.constant 0 : index
    %2 = vector.load %arg3[%c0_3, %c0_4] : memref<4x1xf32, #tpu.memory_space<vmem>>, vector<4x1xf32>
    %cst = arith.constant dense<0xFF800000> : vector<8xf32>
    %3 = vector.multi_reduction <maximumf>, %0, %cst [0] : vector<4x8xf32> to vector<8xf32>
    %4 = vector.shape_cast %3 : vector<8xf32> to vector<1x8xf32>
    %5 = vector.broadcast %4 : vector<1x8xf32> to vector<4x8xf32>
    %6 = arith.subf %0, %5 : vector<4x8xf32>
    %7 = math.exp %6 : vector<4x8xf32>
    %cst_5 = arith.constant dense<0.000000e+00> : vector<8xf32>
    %8 = vector.multi_reduction <add>, %7, %cst_5 [0] : vector<4x8xf32> to vector<8xf32>
    %9 = vector.shape_cast %8 : vector<8xf32> to vector<1x8xf32>
    %10 = tpu.iota {dimensions = array<i32: 0>} : vector<4x8xi32>
    %11 = vector.broadcast %1 : vector<1x8xi32> to vector<4x8xi32>
    %12 = arith.cmpi eq, %10, %11 : vector<4x8xi32>
    %cst_6 = arith.constant 0.000000e+00 : f32
    %13 = vector.broadcast %cst_6 : f32 to vector<4x8xf32>
    %14 = arith.select %12, %0, %13 : vector<4x8xi1>, vector<4x8xf32>
    %cst_7 = arith.constant dense<0.000000e+00> : vector<8xf32>
    %15 = vector.multi_reduction <add>, %14, %cst_7 [0] : vector<4x8xf32> to vector<8xf32>
    %16 = vector.shape_cast %15 : vector<8xf32> to vector<1x8xf32>
    %cst_8 = arith.constant 0.000000e+00 : f32
    %17 = vector.broadcast %cst_8 : f32 to vector<4x8xf32>
    %18 = arith.select %12, %7, %17 : vector<4x8xi1>, vector<4x8xf32>
    %cst_9 = arith.constant dense<0.000000e+00> : vector<8xf32>
    %19 = vector.multi_reduction <add>, %18, %cst_9 [0] : vector<4x8xf32> to vector<8xf32>
    %20 = vector.shape_cast %19 : vector<8xf32> to vector<1x8xf32>
    %cst_10 = arith.constant 0.000000e+00 : f32
    %21 = vector.shape_cast %2 : vector<4x1xf32> to vector<4x1xf32>
    %22 = vector.broadcast %21 : vector<4x1xf32> to vector<4x8xf32>
    %23 = vector.broadcast %cst_10 : f32 to vector<4x8xf32>
    %24 = arith.select %12, %22, %23 : vector<4x8xi1>, vector<4x8xf32>
    %cst_11 = arith.constant dense<0.000000e+00> : vector<8xf32>
    %25 = vector.multi_reduction <add>, %24, %cst_11 [0] : vector<4x8xf32> to vector<8xf32>
    %26 = vector.shape_cast %25 : vector<8xf32> to vector<1x8xf32>
    %27 = math.log %9 : vector<1x8xf32>
    %28 = arith.addf %27, %4 : vector<1x8xf32>
    %29 = arith.subf %28, %16 : vector<1x8xf32>
    %30 = arith.divf %20, %9 : vector<1x8xf32>
    %cst_12 = arith.constant 1.000000e+00 : f32
    %31 = vector.broadcast %cst_12 : f32 to vector<1x8xf32>
    %32 = arith.subf %31, %30 : vector<1x8xf32>
    %cst_13 = arith.constant 0.000000e+00 : f32
    %33 = vector.broadcast %cst_13 : f32 to vector<1x8xf32>
    %34 = arith.maximumf %32, %33 : vector<1x8xf32>
    %35 = arith.mulf %34, %34 : vector<1x8xf32>
    %36 = arith.mulf %26, %35 : vector<1x8xf32>
    %37 = arith.mulf %36, %29 : vector<1x8xf32>
    %c8_i32 = arith.constant 8 : i32
    %38 = arith.muli %arg0, %c8_i32 : i32
    %39 = tpu.iota {dimensions = array<i32: 1>} : vector<1x8xi32>
    %40 = vector.broadcast %38 : i32 to vector<1x8xi32>
    %41 = arith.addi %40, %39 : vector<1x8xi32>
    %c8_i32_14 = arith.constant 8 : i32
    %42 = vector.broadcast %c8_i32_14 : i32 to vector<1x8xi32>
    %43 = arith.cmpi slt, %41, %42 : vector<1x8xi32>
    %cst_15 = arith.constant 0.000000e+00 : f32
    %44 = vector.broadcast %cst_15 : f32 to vector<1x8xf32>
    %45 = arith.select %43, %37, %44 : vector<1x8xi1>, vector<1x8xf32>
    %46 = vector.shape_cast %45 : vector<1x8xf32> to vector<1x1x8xf32>
    %cst_16 = arith.constant dense<0.000000e+00> : vector<1xf32>
    %47 = vector.multi_reduction <add>, %46, %cst_16 [1, 2] : vector<1x1x8xf32> to vector<1xf32>
    %48 = vector.shape_cast %47 : vector<1xf32> to vector<1x1x1xf32>
    %49 = vector.extract %48[0, 0, 0] : f32 from vector<1x1x1xf32>
    %50 = vector.broadcast %49 : f32 to vector<1x1xf32>
    %51 = vector.shape_cast %50 : vector<1x1xf32> to vector<1x1xf32>
    %52 = vector.broadcast %51 : vector<1x1xf32> to vector<1x128xf32>
    %c0_17 = arith.constant 0 : index
    %c0_18 = arith.constant 0 : index
    %53 = vector.load %arg4[%c0_17, %c0_18] : memref<1x128xf32, #tpu.memory_space<vmem>>, vector<1x128xf32>
    tpu.vector_store %arg4[%c0_17, %c0_18], %52 {strides = array<i32>} : memref<1x128xf32, #tpu.memory_space<vmem>>, vector<1x128xf32>,
    return
  }
  func.func @transform_0(%arg0: i32) -> (i32, i32) {
    %c0_i32 = arith.constant 0 : i32
    %c0_i32_0 = arith.constant 0 : i32
    return %c0_i32, %arg0 : i32, i32
  }
  func.func @transform_1(%arg0: i32) -> (i32, i32) {
    %c0_i32 = arith.constant 0 : i32
    %c0_i32_0 = arith.constant 0 : i32
    return %c0_i32, %arg0 : i32, i32
  }
  func.func @transform_2(%arg0: i32) -> (i32, i32) {
    %c0_i32 = arith.constant 0 : i32
    %c0_i32_0 = arith.constant 0 : i32
    %c0_i32_1 = arith.constant 0 : i32
    return %c0_i32, %c0_i32_0 : i32, i32
  }
  func.func @transform_3(%arg0: i32) -> (i32, i32) {
    %c0_i32 = arith.constant 0 : i32
    %c0_i32_0 = arith.constant 0 : i32
    return %c0_i32, %arg0 : i32, i32
  }
}

</mosaic_0001>

<bundles_post_ra>
// kernel: tpu_custom_call.1
= control target key start
LH: loop header
LB: loop body
LE: loop exit
PB: predicated region body
PF: predicated region fallthrough
CT: control target
= control target key end

     0   :  { %v153_v1 = vmov 0   ;;  %s204_s0 = inlined_call_operand.vmem [shape: f32[4,8], index: 0, kind: input, shape index: {}]   ;;  %s205_s1 = inlined_call_operand.vmem [shape: s32[1,8], index: 1, kind: input, shape index: {}]   ;;  %s206_s2 = inlined_call_operand.vmem [shape: f32[4,1], index: 2, kind: input, shape index: {}]   ;;  %s207_s3 = inlined_call_operand.hbm [shape: f32[1,128], index: 3, kind: output, shape index: {}]  }
   0x1   :  { %v17_v0 = vld [vmem:[%s206_s2] sm:$0xf]  ;;  %122 = vset.pattern.permute.xlu0 %v153_v1 }
   0x2   :  { %8 = vsyncpa [#allocation3], 0  ;;  %61 = vperm.xlu0 %122, %v17_v0   ;;  %vm18_vm0 = vcmask 60416   ;;  %v15_v2 = vld [vmem:[%s204_s0] sm:$0xf]  ;;  %v36_v13 = vlaneseq  ;;  %vm90_vm3 = vcmask 57344  }
   0x3   :  { %v19_v3 = vsel %vm18_vm0, %v15_v2, -inf  ;;  %v117_v17 = vld [vmem:[%s205_s1] ss:$0 sm:$0xff]  ;;  %s154_s0 = smov [#allocation2]  }
   0x4   :  { %v20_v4 = vrot.slane %v19_v3, 4  ;;  %v37_v15 = vshrl.u32 %v36_v13, 7  ;;  %v85_v55 = vand.u32 127, %v36_v13  ;;  %s109_s1 = sshll.u32 %s154_s0, 4  ;;  %s110_s1 = int_to_ptr.vmem [resolvable:$true] %s109_s1 }
   0x5   :  { %s129_s18 = scalar_lea.vmem %s110_s1, 16  ;;  %s133_s19 = scalar_lea.vmem %s110_s1, 32 }
   0x6   :  { %v21_v5 = vmax.f32 %v19_v3, %v20_v4  ;;  %vm42_vm1 = vcmp.eq.s32.totalorder %v37_v15, %v117_v17  ;;  %vm88_vm2 = vcmp.lt.s32.totalorder %v85_v55, 8  ;;  %p130_p0 = scmp.ne.s32.totalorder %s110_s1, %s129_s18  ;;  %p134_p1 = scmp.lt.s32.totalorder %s110_s1, %s110_s1 }
   0x7   :  { %v43_v27 = vsel %vm42_vm1, %v15_v2, 0.0  ;;  %p135_p2 = scmp.lt.s32.totalorder %s133_s19, %s129_s18 }
   0x8   :  { %v22_v6 = vrot.slane %v21_v5, 2  ;;  %v44_v29 = vsel %vm18_vm0, %v43_v27, 0.0 }
   0x9   :  { %v45_v31 = vrot.slane %v44_v29, 4  ;;  %p136_p3 = por %p135_p2, %p134_p1 }
   0xa   :  { %v23_v7 = vmax.f32 %v21_v5, %v22_v6 }
   0xb   :  { %v46_v33 = vadd.f32 %v45_v31, %v44_v29  ;;  %p137_p4 = pnand %p136_p3, %p130_p0 }
   0xc   :  { %v24_v8 = vrot.slane %v23_v7, 1 }
   0xd   :  { %v47_v36 = vrot.slane %v46_v33, 2 }
   0xe   :  { %v25_v9 = vmax.f32 %v23_v7, %v24_v8 }
   0xf   :  { %v48_v39 = vadd.f32 %v47_v36, %v46_v33 }
  0x10   :  { %v26_v10 = vsub.f32 %v15_v2, %v25_v9 }
  0x11   :  { %v49_v46 = vrot.slane %v48_v39, 1 }
  0x12   :  { %v27_v11 = vmul.f32 1.442695, %v26_v10 }
  0x13   :  { %v50_v51 = vadd.f32 %v49_v46, %v48_v39 }
  0x14   :  { %123 = vpow2.f32 %v27_v11 }
  0x1e   :  { %v124_v12 = vpop.eup %123 }
  0x1f   :  { %v29_v14 = vsel %vm18_vm0, %v124_v12, 0.0  ;;  %v51_v19 = vsel %vm42_vm1, %v124_v12, 0.0 }
  0x20   :  { %v30_v16 = vrot.slane %v29_v14, 4  ;;  %v52_v21 = vsel %vm18_vm0, %v51_v19, 0.0 }
  0x21   :  { %v53_v23 = vrot.slane %v52_v21, 4 }
  0x22   :  { %v31_v18 = vadd.f32 %v30_v16, %v29_v14 }
  0x23   :  { %v54_v25 = vadd.f32 %v53_v23, %v52_v21 }
  0x24   :  { %v32_v20 = vrot.slane %v31_v18, 2 }
  0x25   :  { %v55_v28 = vrot.slane %v54_v25, 2 }
  0x26   :  { %v33_v22 = vadd.f32 %v32_v20, %v31_v18 }
  0x27   :  { %v56_v30 = vadd.f32 %v55_v28, %v54_v25 }
  0x28   :  { %v34_v24 = vrot.slane %v33_v22, 1 }
  0x29   :  { %v57_v32 = vrot.slane %v56_v30, 1 }
  0x2a   :  { %v35_v26 = vadd.f32 %v34_v24, %v33_v22 }
  0x2b   :  { %v58_v34 = vadd.f32 %v57_v32, %v56_v30 }
  0x2c   :  { %125 = vrcp.f32 %v35_v26 }
  0x2d   :  { %127 = vlog2.f32 %v35_v26 }
  0x36   :  { %v126_v35 = vpop.eup %125 }
  0x37   :  { %v77_v37 = vmul.f32 %v126_v35, %v58_v34  ;;  %v128_v41 = vpop.eup %127 }
  0x38   :  { %v73_v47 = vmul.f32 0.6931472, %v128_v41 }
  0x39   :  { %v78_v44 = vsub.f32 1.0, %v77_v37 }
  0x3a   :  { %v74_v52 = vadd.f32 %v73_v47, %v25_v9 }
  0x3b   :  { %v79_v49 = vmax.f32 %v78_v44, 0.0 }
  0x3c   :  { %v75_v57 = vsub.f32 %v74_v52, %v50_v51 }
  0x3d   :  { %v80_v54 = vmul.f32 %v79_v49, %v79_v49 }
  0x81   :  { %v62_v38 = vpop.permute.xlu0 %61 }
  0x82   :  { %v64_v40 = vsel %vm42_vm1, %v62_v38, 0.0 }
  0x83   :  { %v65_v42 = vsel %vm18_vm0, %v64_v40, 0.0 }
  0x84   :  { %v66_v43 = vrot.slane %v65_v42, 4 }
  0x86   :  { %v67_v45 = vadd.f32 %v66_v43, %v65_v42 }
  0x88   :  { %v68_v48 = vrot.slane %v67_v45, 2 }
  0x8a   :  { %v69_v50 = vadd.f32 %v68_v48, %v67_v45 }
  0x8c   :  { %v70_v53 = vrot.slane %v69_v50, 1 }
  0x8e   :  { %v71_v56 = vadd.f32 %v70_v53, %v69_v50 }
  0x90   :  { %v81_v58 = vmul.f32 %v80_v54, %v71_v56 }
  0x92   :  { %v82_v59 = vmul.f32 %v81_v58, %v75_v57 }
  0x94   :  { %v89_v60 = vsel %vm88_vm2, %v82_v59, 0.0 }
  0x95   :  { %v91_v61 = vsel %vm90_vm3, %v89_v60, 0.0 }
  0x96   :  { %92 = vadd.xlane.f32.xlu0 %v91_v61 }
 0x123   :  { %v93_v62 = vpop.xlane.xlu0 %92 }
 0x124   :  { %v94_v63 = vrot.slane %v93_v62, 4 }
 0x126   :  { %v95_v0 = vadd.f32 %v94_v63, %v93_v62 }
 0x128   :  { %v96_v1 = vrot.slane %v95_v0, 2 }
 0x12a   :  { %v97_v2 = vadd.f32 %v96_v1, %v95_v0 }
 0x12c   :  { %v98_v3 = vrot.slane %v97_v2, 1 }
 0x12e   :  { %v99_v4 = vadd.f32 %v98_v3, %v97_v2 }
 0x130   :  { %118 = vpush %v99_v4 }
 0x161   :  { %s119_s17 = spop %118 }
 0x162   :  { %v101_v5 = vstv %s119_s17 }
 0x163   :  { %102 = vst [vmem:[#allocation2] sm:$0x1] %v101_v5 }
 0x164   :  { %140 = shalt.err (!%p137_p4)
}
 0x165   :  { %s141_s22 = scalar_lea.hbm %s207_s3, 16 }
 0x166   :  { %p142_p5 = scmp.ne.s32.totalorder %s207_s3, %s141_s22  ;;  %p145_p6 = scmp.lt.u32.totalorder %s141_s22, %s207_s3 }
 0x168   :  { %p147_p7 = pnand %p145_p6, %p142_p5 }
 0x16a   :  { %150 = shalt.err (!%p147_p7)
}
 0x16b   :  { %112 = dma.vmem_to_hbm [thread:$0]  %s110_s1, 16, %s207_s3, [#allocation3]  }
 0x16c   :  { %151 = dma.done.wait [#allocation3], 16  }
 0x16d   :  { %152 = vsyncadd [#allocation3], 4294967280 }
 0x16e   :  { %116 = vsyncpa [#allocation3], 1 }

</bundles_post_ra>
